<compile_context>
chip_gen: v5e
topology: v5e:2x2
jax: 0.10.0
libtpu: 0.0.40
codegen_flags: <defaults>
</compile_context>

<pallas_src>
import functools

import jax
import jax.numpy as jnp
from jax.experimental import pallas as pl
from jax.experimental.pallas import tpu as pltpu

EPS = 1e-6  # PairwiseDistance eps: || a - b + eps ||


def _triplet_kernel(ref_ref, pos1_ref, pos2_ref, neg1_ref, neg2_ref,
                    out_ref, acc_ref, *, margin, valid_rows, total_rows):
    """One grid step: TILE_R rows of each of the 5 segments.

    ref/pos*/neg* refs: [1, TILE_R, D] in VMEM.
    out_ref: [1, 1] SMEM scalar (written only at the last step).
    acc_ref: [TILE_R, 1] f32 VMEM accumulator (persists across grid steps).
    """
    i = pl.program_id(0)

    @pl.when(i == 0)
    def _init():
        acc_ref[...] = jnp.zeros_like(acc_ref)

    ref = ref_ref[0].astype(jnp.float32)  # [TILE_R, D]

    def _hinge(p_ref, n_ref):
        pos = p_ref[0].astype(jnp.float32)
        neg = n_ref[0].astype(jnp.float32)
        # PairwiseDistance(p=2): sqrt(sum((a - b + eps)^2)) — reduction over the lane axis.
        d_pos = jnp.sqrt(jnp.sum((ref - pos + EPS) ** 2, axis=-1, keepdims=True))
        d_neg = jnp.sqrt(jnp.sum((ref - neg + EPS) ** 2, axis=-1, keepdims=True))
        return jnp.maximum(d_pos - d_neg + margin, 0.0)  # [TILE_R, 1]

    # Ref tile loaded once, used for both triplet pairs (saves 1/6 of HBM traffic).
    h = _hinge(pos1_ref, neg1_ref) + _hinge(pos2_ref, neg2_ref)

    # TODO(synk): the PyTorch _sanity_check asserts (isnan / <=0 counts) have no clean
    # in-kernel equivalent; distances here are positive by construction.

    # Mask rows of a ragged last tile (padding past B would otherwise contribute garbage).
    tile_rows = h.shape[0]
    row = i * tile_rows + jax.lax.broadcasted_iota(jnp.int32, h.shape, 0)
    h = jnp.where(row < valid_rows, h, 0.0)

    acc_ref[...] += h

    @pl.when(i == pl.num_programs(0) - 1)
    def _finalize():
        # Mean over the global 2B triplets (NOT the tile size).
        out_ref[0, 0] = jnp.sum(acc_ref[...]) * (1.0 / total_rows)


def _choose_tile_rows(b, d, itemsize,
                      max_rows=2048, budget_bytes=12 * 1024 * 1024):
    """Pick TILE_R (multiple of 8) so that 5 operands x 2 double-buffers fit the budget."""
    per_row = 5 * 2 * d * itemsize
    t = max(8, int(budget_bytes // per_row))
    t = max(8, (t // 8) * 8)
    t = min(t, max_rows)
    if b <= t:
        return b  # single full-segment tile (full-dim blocks are always legal)
    return t


@functools.partial(jax.jit, static_argnames=("margin",))
def triplet_loss(local_emb, margin=0.1):
    """Pallas implementation of TripletLoss.forward with pairwise-Euclidean distance.

    local_emb: [5*B, D] float (f32 or bf16) array. Returns a scalar float32 loss.
    """
    total, d = local_emb.shape
    assert total % 5 == 0, "first dim must be divisible by 5 (ref/pos1/pos2/neg1/neg2)"
    b = total // 5

    # Free view (no HBM copy): split rows into the 5 logical segments.
    emb5 = local_emb.reshape(5, b, d)

    tile_r = _choose_tile_rows(b, d, jnp.dtype(local_emb.dtype).itemsize)
    grid = (pl.cdiv(b, tile_r),)

    def seg_spec(seg):
        # Same block-row i of segment `seg`; D stays whole on the lane axis.
        return pl.BlockSpec((1, tile_r, d), lambda i, seg=seg: (seg, i, 0))

    kernel = functools.partial(
        _triplet_kernel,
        margin=float(margin),
        valid_rows=b,
        total_rows=2 * b,
    )

    out = pl.pallas_call(
        kernel,
        out_shape=jax.ShapeDtypeStruct((1, 1), jnp.float32),
        grid=grid,
        in_specs=[seg_spec(0), seg_spec(1), seg_spec(2), seg_spec(3), seg_spec(4)],
        out_specs=pl.BlockSpec((1, 1), lambda i: (0, 0),
                               memory_space=pltpu.MemorySpace.SMEM),
        scratch_shapes=[pltpu.VMEM((tile_r, 1), jnp.float32)],
        compiler_params=pltpu.CompilerParams(
            dimension_semantics=("arbitrary",),
            vmem_limit_bytes=32 * 1024 * 1024,
        ),
    )(emb5, emb5, emb5, emb5, emb5)
    return out[0, 0]


def _reference_loss(local_emb, margin=0.1):
    # Pure-JAX reference matching the PyTorch forward (PairwiseDistance-style eps).
    ref, pos1, pos2, neg1, neg2 = jnp.split(local_emb, 5, axis=0)
    ref_rep = jnp.concatenate([ref, ref], axis=0)
    pos = jnp.concatenate([pos1, pos2], axis=0)
    neg = jnp.concatenate([neg1, neg2], axis=0)
    d_pos = jnp.sqrt(jnp.sum((ref_rep - pos + EPS) ** 2, axis=-1))
    d_neg = jnp.sqrt(jnp.sum((ref_rep - neg + EPS) ** 2, axis=-1))
    return jnp.mean(jnp.maximum(d_pos - d_neg + margin, 0.0))


if __name__ == "__main__":
    key = jax.random.PRNGKey(0)
    B, D = 8, 128                       # 5*B = 40 rows total
    local_emb = jax.random.normal(key, (5 * B, D), dtype=jnp.float32)

    loss = triplet_loss(local_emb, margin=0.1)
    loss = jax.block_until_ready(loss)

    ref = _reference_loss(local_emb, margin=0.1)
    assert jnp.allclose(loss, ref, atol=1e-5, rtol=1e-5), (loss, ref)
    print("KERNEL_OK")
</pallas_src>

<mosaic_0001>
module attributes {stable_mosaic.version = 11 : i64} {
  func.func @_triplet_kernel(%arg0: i32, %arg1: memref<1x8x128xf32, #tpu.memory_space<vmem>>, %arg2: memref<1x8x128xf32, #tpu.memory_space<vmem>>, %arg3: memref<1x8x128xf32, #tpu.memory_space<vmem>>, %arg4: memref<1x8x128xf32, #tpu.memory_space<vmem>>, %arg5: memref<1x8x128xf32, #tpu.memory_space<vmem>>, %arg6: memref<1x1xf32, #tpu.memory_space<smem>>, %arg7: memref<8x1xf32, #tpu.memory_space<vmem>>) attributes {dimension_semantics = [#tpu.dimension_semantics<arbitrary>], iteration_bounds = array<i64: 1>, scalar_prefetch = 0 : i64, scratch_operands = 1 : i64, tpu.core_type = #tpu.core_type<tc>, window_params = [{transform_indices = @transform_0, window_bounds = array<i64: 1, 8, 128>}, {transform_indices = @transform_1, window_bounds = array<i64: 1, 8, 128>}, {transform_indices = @transform_2, window_bounds = array<i64: 1, 8, 128>}, {transform_indices = @transform_3, window_bounds = array<i64: 1, 8, 128>}, {transform_indices = @transform_4, window_bounds = array<i64: 1, 8, 128>}, {transform_indices = @transform_5, window_bounds = array<i64: 1, 1>}]} {
    %c0_i32 = arith.constant 0 : i32
    %0 = arith.cmpi eq, %arg0, %c0_i32 : i32
    %1 = arith.extui %0 : i1 to i32
    %c0_i32_0 = arith.constant 0 : i32
    %2 = arith.cmpi ne, %1, %c0_i32_0 : i32
    scf.if %2 {
      %cst_34 = arith.constant 0.000000e+00 : f32
      %66 = vector.broadcast %cst_34 : f32 to vector<8x1xf32>
      %c0_35 = arith.constant 0 : index
      %c0_36 = arith.constant 0 : index
      %67 = vector.load %arg7[%c0_35, %c0_36] : memref<8x1xf32, #tpu.memory_space<vmem>>, vector<8x1xf32>
      tpu.vector_store %arg7[%c0_35, %c0_36], %66 {strides = array<i32>} : memref<8x1xf32, #tpu.memory_space<vmem>>, vector<8x1xf32>,
    } else {
    }
    %c0 = arith.constant 0 : index
    %c0_1 = arith.constant 0 : index
    %c0_2 = arith.constant 0 : index
    %3 = vector.load %arg1[%c0, %c0_1, %c0_2] : memref<1x8x128xf32, #tpu.memory_space<vmem>>, vector<1x8x128xf32>
    %4 = vector.shape_cast %3 : vector<1x8x128xf32> to vector<8x128xf32>
    %c0_3 = arith.constant 0 : index
    %c0_4 = arith.constant 0 : index
    %c0_5 = arith.constant 0 : index
    %5 = vector.load %arg2[%c0_3, %c0_4, %c0_5] : memref<1x8x128xf32, #tpu.memory_space<vmem>>, vector<1x8x128xf32>
    %6 = vector.shape_cast %5 : vector<1x8x128xf32> to vector<8x128xf32>
    %c0_6 = arith.constant 0 : index
    %c0_7 = arith.constant 0 : index
    %c0_8 = arith.constant 0 : index
    %7 = vector.load %arg4[%c0_6, %c0_7, %c0_8] : memref<1x8x128xf32, #tpu.memory_space<vmem>>, vector<1x8x128xf32>
    %8 = vector.shape_cast %7 : vector<1x8x128xf32> to vector<8x128xf32>
    %9 = arith.subf %4, %6 : vector<8x128xf32>
    %cst = arith.constant 9.99999997E-7 : f32
    %10 = vector.broadcast %cst : f32 to vector<8x128xf32>
    %11 = arith.addf %9, %10 : vector<8x128xf32>
    %12 = arith.mulf %11, %11 : vector<8x128xf32>
    %cst_9 = arith.constant dense<0.000000e+00> : vector<8xf32>
    %13 = vector.multi_reduction <add>, %12, %cst_9 [1] : vector<8x128xf32> to vector<8xf32>
    %14 = vector.shape_cast %13 : vector<8xf32> to vector<8x1xf32>
    %15 = math.sqrt %14 : vector<8x1xf32>
    %16 = arith.subf %4, %8 : vector<8x128xf32>
    %cst_10 = arith.constant 9.99999997E-7 : f32
    %17 = vector.broadcast %cst_10 : f32 to vector<8x128xf32>
    %18 = arith.addf %16, %17 : vector<8x128xf32>
    %19 = arith.mulf %18, %18 : vector<8x128xf32>
    %cst_11 = arith.constant dense<0.000000e+00> : vector<8xf32>
    %20 = vector.multi_reduction <add>, %19, %cst_11 [1] : vector<8x128xf32> to vector<8xf32>
    %21 = vector.shape_cast %20 : vector<8xf32> to vector<8x1xf32>
    %22 = math.sqrt %21 : vector<8x1xf32>
    %23 = arith.subf %15, %22 : vector<8x1xf32>
    %cst_12 = arith.constant 1.000000e-01 : f32
    %24 = vector.broadcast %cst_12 : f32 to vector<8x1xf32>
    %25 = arith.addf %23, %24 : vector<8x1xf32>
    %cst_13 = arith.constant 0.000000e+00 : f32
    %26 = vector.broadcast %cst_13 : f32 to vector<8x1xf32>
    %27 = arith.maximumf %25, %26 : vector<8x1xf32>
    %c0_14 = arith.constant 0 : index
    %c0_15 = arith.constant 0 : index
    %c0_16 = arith.constant 0 : index
    %28 = vector.load %arg3[%c0_14, %c0_15, %c0_16] : memref<1x8x128xf32, #tpu.memory_space<vmem>>, vector<1x8x128xf32>
    %29 = vector.shape_cast %28 : vector<1x8x128xf32> to vector<8x128xf32>
    %c0_17 = arith.constant 0 : index
    %c0_18 = arith.constant 0 : index
    %c0_19 = arith.constant 0 : index
    %30 = vector.load %arg5[%c0_17, %c0_18, %c0_19] : memref<1x8x128xf32, #tpu.memory_space<vmem>>, vector<1x8x128xf32>
    %31 = vector.shape_cast %30 : vector<1x8x128xf32> to vector<8x128xf32>
    %32 = arith.subf %4, %29 : vector<8x128xf32>
    %cst_20 = arith.constant 9.99999997E-7 : f32
    %33 = vector.broadcast %cst_20 : f32 to vector<8x128xf32>
    %34 = arith.addf %32, %33 : vector<8x128xf32>
    %35 = arith.mulf %34, %34 : vector<8x128xf32>
    %cst_21 = arith.constant dense<0.000000e+00> : vector<8xf32>
    %36 = vector.multi_reduction <add>, %35, %cst_21 [1] : vector<8x128xf32> to vector<8xf32>
    %37 = vector.shape_cast %36 : vector<8xf32> to vector<8x1xf32>
    %38 = math.sqrt %37 : vector<8x1xf32>
    %39 = arith.subf %4, %31 : vector<8x128xf32>
    %cst_22 = arith.constant 9.99999997E-7 : f32
    %40 = vector.broadcast %cst_22 : f32 to vector<8x128xf32>
    %41 = arith.addf %39, %40 : vector<8x128xf32>
    %42 = arith.mulf %41, %41 : vector<8x128xf32>
    %cst_23 = arith.constant dense<0.000000e+00> : vector<8xf32>
    %43 = vector.multi_reduction <add>, %42, %cst_23 [1] : vector<8x128xf32> to vector<8xf32>
    %44 = vector.shape_cast %43 : vector<8xf32> to vector<8x1xf32>
    %45 = math.sqrt %44 : vector<8x1xf32>
    %46 = arith.subf %38, %45 : vector<8x1xf32>
    %cst_24 = arith.constant 1.000000e-01 : f32
    %47 = vector.broadcast %cst_24 : f32 to vector<8x1xf32>
    %48 = arith.addf %46, %47 : vector<8x1xf32>
    %cst_25 = arith.constant 0.000000e+00 : f32
    %49 = vector.broadcast %cst_25 : f32 to vector<8x1xf32>
    %50 = arith.maximumf %48, %49 : vector<8x1xf32>
    %51 = arith.addf %27, %50 : vector<8x1xf32>
    %c8_i32 = arith.constant 8 : i32
    %52 = arith.muli %arg0, %c8_i32 : i32
    %53 = tpu.iota {dimensions = array<i32: 0>} : vector<8x1xi32>
    %54 = vector.broadcast %52 : i32 to vector<8x1xi32>
    %55 = arith.addi %54, %53 : vector<8x1xi32>
    %c8_i32_26 = arith.constant 8 : i32
    %56 = vector.broadcast %c8_i32_26 : i32 to vector<8x1xi32>
    %57 = arith.cmpi slt, %55, %56 : vector<8x1xi32>
    %cst_27 = arith.constant 0.000000e+00 : f32
    %58 = vector.broadcast %cst_27 : f32 to vector<8x1xf32>
    %59 = arith.select %57, %51, %58 : vector<8x1xi1>, vector<8x1xf32>
    %c0_28 = arith.constant 0 : index
    %c0_29 = arith.constant 0 : index
    %60 = vector.load %arg7[%c0_28, %c0_29] : memref<8x1xf32, #tpu.memory_space<vmem>>, vector<8x1xf32>
    %61 = arith.addf %60, %59 : vector<8x1xf32>
    %c0_30 = arith.constant 0 : index
    %c0_31 = arith.constant 0 : index
    %62 = vector.load %arg7[%c0_30, %c0_31] : memref<8x1xf32, #tpu.memory_space<vmem>>, vector<8x1xf32>
    tpu.vector_store %arg7[%c0_30, %c0_31], %61 {strides = array<i32>} : memref<8x1xf32, #tpu.memory_space<vmem>>, vector<8x1xf32>,
    %c0_i32_32 = arith.constant 0 : i32
    %63 = arith.cmpi eq, %arg0, %c0_i32_32 : i32
    %64 = arith.extui %63 : i1 to i32
    %c0_i32_33 = arith.constant 0 : i32
    %65 = arith.cmpi ne, %64, %c0_i32_33 : i32
    scf.if %65 {
      %c0_34 = arith.constant 0 : index
      %c0_35 = arith.constant 0 : index
      %66 = vector.load %arg7[%c0_34, %c0_35] : memref<8x1xf32, #tpu.memory_space<vmem>>, vector<8x1xf32>
      %67 = vector.shape_cast %66 : vector<8x1xf32> to vector<1x8x1xf32>
      %cst_36 = arith.constant dense<0.000000e+00> : vector<1xf32>
      %68 = vector.multi_reduction <add>, %67, %cst_36 [1, 2] : vector<1x8x1xf32> to vector<1xf32>
      %69 = vector.shape_cast %68 : vector<1xf32> to vector<1x1x1xf32>
      %70 = vector.extract %69[0, 0, 0] : f32 from vector<1x1x1xf32>
      %cst_37 = arith.constant 6.250000e-02 : f32
      %71 = arith.mulf %70, %cst_37 : f32
      %c0_38 = arith.constant 0 : index
      %c0_39 = arith.constant 0 : index
      %72 = memref.load %arg6[%c0_38, %c0_39] : memref<1x1xf32, #tpu.memory_space<smem>>
      memref.store %71, %arg6[%c0_38, %c0_39] : memref<1x1xf32, #tpu.memory_space<smem>>
    } else {
    }
    return
  }
  func.func @transform_0(%arg0: i32) -> (i32, i32, i32) {
    %c0_i32 = arith.constant 0 : i32
    %c0_i32_0 = arith.constant 0 : i32
    %c0_i32_1 = arith.constant 0 : i32
    return %c0_i32, %arg0, %c0_i32_0 : i32, i32, i32
  }
  func.func @transform_1(%arg0: i32) -> (i32, i32, i32) {
    %c1_i32 = arith.constant 1 : i32
    %c0_i32 = arith.constant 0 : i32
    %c0_i32_0 = arith.constant 0 : i32
    return %c1_i32, %arg0, %c0_i32 : i32, i32, i32
  }
  func.func @transform_2(%arg0: i32) -> (i32, i32, i32) {
    %c2_i32 = arith.constant 2 : i32
    %c0_i32 = arith.constant 0 : i32
    %c0_i32_0 = arith.constant 0 : i32
    return %c2_i32, %arg0, %c0_i32 : i32, i32, i32
  }
  func.func @transform_3(%arg0: i32) -> (i32, i32, i32) {
    %c3_i32 = arith.constant 3 : i32
    %c0_i32 = arith.constant 0 : i32
    %c0_i32_0 = arith.constant 0 : i32
    return %c3_i32, %arg0, %c0_i32 : i32, i32, i32
  }
  func.func @transform_4(%arg0: i32) -> (i32, i32, i32) {
    %c4_i32 = arith.constant 4 : i32
    %c0_i32 = arith.constant 0 : i32
    %c0_i32_0 = arith.constant 0 : i32
    return %c4_i32, %arg0, %c0_i32 : i32, i32, i32
  }
  func.func @transform_5(%arg0: i32) -> (i32, i32) {
    %c0_i32 = arith.constant 0 : i32
    %c0_i32_0 = arith.constant 0 : i32
    %c0_i32_1 = arith.constant 0 : i32
    return %c0_i32, %c0_i32_0 : i32, i32
  }
}

</mosaic_0001>

<bundles_post_ra>
// kernel: triplet_loss.1
= control target key start
LH: loop header
LB: loop body
LE: loop exit
PB: predicated region body
PF: predicated region fallthrough
CT: control target
= control target key end

     0   :  { %10 = vsyncpa [#allocation4], 0  ;;  %s442_s0 = inlined_call_operand.hbm [shape: f32[5,8,128], index: 0, kind: input, shape index: {}, may-alias: {0,1,2,3,4}]   ;;  %s443_s1 = inlined_call_operand.hbm [shape: f32[5,8,128], index: 1, kind: input, shape index: {}, may-alias: {0,1,2,3,4}]   ;;  %s444_s2 = inlined_call_operand.hbm [shape: f32[5,8,128], index: 2, kind: input, shape index: {}, may-alias: {0,1,2,3,4}]   ;;  %s445_s3 = inlined_call_operand.hbm [shape: f32[5,8,128], index: 3, kind: input, shape index: {}, may-alias: {0,1,2,3,4}]   ;;  %s446_s4 = inlined_call_operand.hbm [shape: f32[5,8,128], index: 4, kind: input, shape index: {}, may-alias: {0,1,2,3,4}]   ;;  %s447_s5 = inlined_call_operand.hbm [shape: f32[1,1], index: 5, kind: output, shape index: {}]  }
   0x1   :  { %11 = vsyncpa [#allocation7], 0 }
   0x2   :  { %12 = vsyncpa [#allocation10], 0  ;;  %s29_s20 = scalar_lea.hbm %s443_s1, 8 }
   0x3   :  { %13 = vsyncpa [#allocation5], 0  ;;  %s31_s21 = sshll.u32 %s29_s20, 4  ;;  %s382_s22 = smov [#allocation6]   ;;  %s32_s21 = int_to_ptr.hbm [resolvable:$true] %s31_s21 }
   0x4   :  { %s33_s23 = sshll.u32 %s382_s22, 4  ;;  %s53_s26 = scalar_lea.hbm %s445_s3, 24  ;;  %s34_s23 = int_to_ptr.vmem [resolvable:$true] %s33_s23 }
   0x5   :  { %36 = dma.hbm_to_vmem [thread:$0]  %s32_s21, 128, %s34_s23, [#allocation7]  }
   0x6   :  { %s55_s27 = sshll.u32 %s53_s26, 4  ;;  %s383_s28 = smov [#allocation9]   ;;  %s56_s27 = int_to_ptr.hbm [resolvable:$true] %s55_s27 }
   0x7   :  { %s57_s29 = sshll.u32 %s383_s28, 4  ;;  %s19_s1 = sshll.u32 %s442_s0, 4  ;;  %s58_s29 = int_to_ptr.vmem [resolvable:$true] %s57_s29  ;;  %s20_s1 = int_to_ptr.hbm [resolvable:$true] %s19_s1 }
   0x8   :  { %60 = dma.hbm_to_vmem [thread:$0]  %s56_s27, 128, %s58_s29, [#allocation10]  }
   0x9   :  { %s384_s7 = smov [#allocation3]   ;;  %s41_s11 = scalar_lea.hbm %s444_s2, 16 }
   0xa   :  { %s21_s8 = sshll.u32 %s384_s7, 4  ;;  %s43_s3 = sshll.u32 %s41_s11, 4  ;;  %s22_s8 = int_to_ptr.vmem [resolvable:$true] %s21_s8  ;;  %s44_s3 = int_to_ptr.hbm [resolvable:$true] %s43_s3 }
   0xb   :  { %24 = dma.hbm_to_vmem [thread:$0]  %s20_s1, 128, %s22_s8, [#allocation4]  }
   0xc   :  { %s385_s12 = smov [#allocation8]   ;;  %s65_s16 = scalar_lea.hbm %s446_s4, 32 }
   0xd   :  { %s45_s13 = sshll.u32 %s385_s12, 4  ;;  %s67_s0 = sshll.u32 %s65_s16, 4  ;;  %s46_s13 = int_to_ptr.vmem [resolvable:$true] %s45_s13  ;;  %s68_s0 = int_to_ptr.hbm [resolvable:$true] %s67_s0 }
   0xe   :  { %48 = dma.hbm_to_vmem [thread:$0]  %s44_s3, 128, %s46_s13, [#allocation7]  }
   0xf   :  { %s386_s17 = smov [#allocation11]  }
  0x10   :  { %s69_s18 = sshll.u32 %s386_s17, 4  ;;  %s70_s18 = int_to_ptr.vmem [resolvable:$true] %s69_s18 }
  0x11   :  { %72 = dma.hbm_to_vmem [thread:$0]  %s68_s0, 128, %s70_s18, [#allocation10]  }
  0x12   :  { %374 = dma.done.wait [#allocation4], 128  }
  0x13   :  { %375 = vsyncadd [#allocation4], 4294967168 }
  0x14   :  { %376 = dma.done.wait [#allocation7], 256  }
  0x15   :  { %377 = vsyncadd [#allocation7], 4294967040 }
  0x16   :  { %378 = dma.done.wait [#allocation10], 256  }
  0x17   :  { %379 = vsyncadd [#allocation10], 4294967040  ;;  %v99_v0 = vld [vmem:[#allocation3] sm:$0xff]  ;;  %v139_v1 = vld [vmem:[#allocation8] sm:$0xff]  ;;  %vm97_vm0 = vcmask 7168   ;;  %v387_v19 = vmov 0.0  }
  0x18   :  { %v100_v2 = vld [vmem:[#allocation6] sm:$0xff]  ;;  %v141_v3 = vsub.f32 %v99_v0, %v139_v1  ;;  %v140_v5 = vld [vmem:[#allocation11] sm:$0xff]  ;;  %v101_v6 = vld [vmem:[#allocation9] sm:$0xff]  ;;  %98 = vst.msk [vmem:[#allocation2] sm:$0xff] %vm97_vm0, %v387_v19  ;;  %s212_s19 = sshll.u32 %s447_s5, 4  ;;  %s388_s22 = smov [#allocation12]   ;;  %s213_s19 = int_to_ptr.hbm [resolvable:$true] %s212_s19 }
  0x19   :  { %v102_v4 = vsub.f32 %v99_v0, %v100_v2  ;;  %v158_v9 = vsub.f32 %v99_v0, %v140_v5  ;;  %v119_v10 = vsub.f32 %v99_v0, %v101_v6 }
  0x1a   :  { %v142_v7 = vadd.f32 1e-06, %v141_v3 }
  0x1b   :  { %v103_v8 = vadd.f32 1e-06, %v102_v4  ;;  %v159_v13 = vadd.f32 1e-06, %v158_v9  ;;  %v120_v14 = vadd.f32 1e-06, %v119_v10 }
  0x1c   :  { %v143_v11 = vmul.f32 %v142_v7, %v142_v7 }
  0x1d   :  { %v104_v12 = vmul.f32 %v103_v8, %v103_v8  ;;  %v160_v15 = vmul.f32 %v159_v13, %v159_v13  ;;  %v121_v16 = vmul.f32 %v120_v14, %v120_v14 }
  0x1e   :  { %144 = vadd.xlane.f32.xlu1 %v143_v11 }
  0x1f   :  { %105 = vadd.xlane.f32.xlu0 %v104_v12  ;;  %v186_v4 = vld [vmem:[#allocation2] sm:$0xff] }
  0x26   :  { %161 = vadd.xlane.f32.xlu1 %v160_v15 }
  0x27   :  { %122 = vadd.xlane.f32.xlu0 %v121_v16 }
  0x91   :  { %v145_v17 = vpop.xlane.xlu1 %144 }
  0x92   :  { %v106_v18 = vpop.xlane.xlu0 %105  ;;  %234 = vrsqrt.f32 %v145_v17  ;;  %vm153_vm1 = vcmp.eq.f32.partialorder %v145_v17, inf  ;;  %vm155_vm2 = vcmp.eq.f32.partialorder %v145_v17, 0.0  ;;  %v156_v47 = vand.u32 2147483648, %v145_v17 }
  0x93   :  { %236 = vrsqrt.f32 %v106_v18  ;;  %vm114_vm3 = vcmp.eq.f32.partialorder %v106_v18, inf  ;;  %vm116_vm4 = vcmp.eq.f32.partialorder %v106_v18, 0.0  ;;  %v117_v50 = vand.u32 2147483648, %v106_v18 }
  0x98   :  { %v235_v20 = vpop.eup %234 }
  0x99   :  { %v237_v21 = vpop.eup %236  ;;  %v147_v22 = vmul.f32 %v235_v20, %v145_v17  ;;  %v162_v23 = vpop.xlane.xlu1 %161 }
  0x9a   :  { %v123_v24 = vpop.xlane.xlu0 %122  ;;  %v108_v25 = vmul.f32 %v237_v21, %v106_v18  ;;  %238 = vrsqrt.f32 %v162_v23  ;;  %vm170_vm5 = vcmp.eq.f32.partialorder %v162_v23, inf  ;;  %v173_v53 = vand.u32 2147483648, %v162_v23 }
  0x9b   :  { %v148_v26 = vmul.f32 %v235_v20, %v147_v22  ;;  %240 = vrsqrt.f32 %v123_v24  ;;  %vm172_vm6 = vcmp.eq.f32.partialorder %v162_v23, 0.0  ;;  %vm131_vm7 = vcmp.eq.f32.partialorder %v123_v24, inf }
  0x9c   :  { %v109_v27 = vmul.f32 %v237_v21, %v108_v25  ;;  %v134_v56 = vand.u32 2147483648, %v123_v24  ;;  %vm133_vm8 = vcmp.eq.f32.partialorder %v123_v24, 0.0 }
  0x9d   :  { %v149_v28 = vmul.f32 0.5, %v148_v26 }
  0x9e   :  { %v110_v29 = vmul.f32 0.5, %v109_v27 }
  0x9f   :  { %v150_v30 = vsub.f32 1.5, %v149_v28 }
  0xa0   :  { %v239_v31 = vpop.eup %238  ;;  %v111_v32 = vsub.f32 1.5, %v110_v29 }
  0xa1   :  { %v241_v33 = vpop.eup %240  ;;  %v164_v34 = vmul.f32 %v239_v31, %v162_v23  ;;  %v151_v36 = vmul.f32 %v235_v20, %v150_v30 }
  0xa2   :  { %v125_v35 = vmul.f32 %v241_v33, %v123_v24  ;;  %v112_v38 = vmul.f32 %v237_v21, %v111_v32 }
  0xa3   :  { %v165_v37 = vmul.f32 %v239_v31, %v164_v34  ;;  %v152_v42 = vmul.f32 %v151_v36, %v145_v17 }
  0xa4   :  { %v126_v39 = vmul.f32 %v241_v33, %v125_v35  ;;  %v113_v44 = vmul.f32 %v112_v38, %v106_v18 }
  0xa5   :  { %v166_v40 = vmul.f32 0.5, %v165_v37  ;;  %v154_v49 = vsel %vm153_vm1, %v145_v17, %v152_v42 }
  0xa6   :  { %v127_v41 = vmul.f32 0.5, %v126_v39  ;;  %v115_v52 = vsel %vm114_vm3, %v106_v18, %v113_v44  ;;  %v157_v57 = vsel %vm155_vm2, %v156_v47, %v154_v49 }
  0xa7   :  { %v167_v43 = vsub.f32 1.5, %v166_v40  ;;  %v118_v61 = vsel %vm116_vm4, %v117_v50, %v115_v52 }
  0xa8   :  { %v128_v45 = vsub.f32 1.5, %v127_v41 }
  0xa9   :  { %v168_v46 = vmul.f32 %v239_v31, %v167_v43 }
  0xaa   :  { %v129_v48 = vmul.f32 %v241_v33, %v128_v45 }
  0xab   :  { %v169_v51 = vmul.f32 %v168_v46, %v162_v23 }
  0xac   :  { %v130_v54 = vmul.f32 %v129_v48, %v123_v24 }
  0xad   :  { %v171_v55 = vsel %vm170_vm5, %v162_v23, %v169_v51 }
  0xae   :  { %v174_v58 = vsel %vm172_vm6, %v173_v53, %v171_v55  ;;  %v132_v59 = vsel %vm131_vm7, %v123_v24, %v130_v54 }
  0xaf   :  { %v175_v60 = vsub.f32 %v157_v57, %v174_v58  ;;  %v135_v62 = vsel %vm133_vm8, %v134_v56, %v132_v59 }
  0xb0   :  { %v136_v63 = vsub.f32 %v118_v61, %v135_v62 }
  0xb1   :  { %v176_v0 = vadd.f32 0.1, %v175_v60 }
  0xb2   :  { %v137_v1 = vadd.f32 0.1, %v136_v63 }
  0xb3   :  { %v177_v2 = vmax.f32 %v176_v0, 0.0 }
  0xb4   :  { %v138_v3 = vmax.f32 %v137_v1, 0.0 }
  0xb6   :  { %v178_v5 = vadd.f32 %v177_v2, %v138_v3 }
  0xb8   :  { %v187_v6 = vadd.f32 %v186_v4, %v178_v5 }
  0xba   :  { %189 = vst.msk [vmem:[#allocation2] sm:$0xff] %vm97_vm0, %v187_v6 }
  0xc1   :  { %v193_v7 = vld [vmem:[#allocation2] sm:$0xff] }
  0xc2   :  { %v194_v8 = vsel %vm97_vm0, %v193_v7, 0.0 }
  0xc3   :  { %195 = vadd.xlane.f32.xlu2 %v194_v8 }
 0x136   :  { %v196_v9 = vpop.xlane.xlu2 %195 }
 0x137   :  { %v197_v10 = vrot.slane %v196_v9, 4 }
 0x139   :  { %v198_v11 = vadd.f32 %v197_v10, %v196_v9 }
 0x13b   :  { %v199_v12 = vrot.slane %v198_v11, 2 }
 0x13d   :  { %v200_v13 = vadd.f32 %v199_v12, %v198_v11 }
 0x13f   :  { %v201_v14 = vrot.slane %v200_v13, 1 }
 0x141   :  { %v202_v15 = vadd.f32 %v201_v14, %v200_v13 }
 0x143   :  { %225 = vpush %v202_v15 }
 0x174   :  { %s226_s20 = spop %225 }
 0x175   :  { %s204_s21 = smul.f32 0.0625, %s226_s20 }
 0x177   :  { %206 = sst [smem:[#allocation12]] %s204_s21 }
 0x178   :  { %215 = dma.smem_to_hbm %s388_s22, 16, %s213_s19, [#allocation5]  }
 0x179   :  { %380 = dma.done.wait [#allocation5], 16  }
 0x17a   :  { %381 = vsyncadd [#allocation5], 4294967280 }
 0x17b   :  { %220 = sfence }
 0x17c   :  { %221 = vsyncpa [#allocation4], 1 }
 0x17d   :  { %222 = vsyncpa [#allocation7], 1 }
 0x17e   :  { %223 = vsyncpa [#allocation10], 1 }
 0x17f   :  { %224 = vsyncpa [#allocation5], 1 }

</bundles_post_ra>
